<compile_context>
chip_gen: v7x
topology: tpu7x:2x2x1
jax: 0.10.0
libtpu: 0.0.40
codegen_flags: <defaults>
</compile_context>

<pallas_src>
import jax
import jax.numpy as jnp
from jax.experimental import pallas as pl
from jax.experimental.pallas import tpu as pltpu

HA = 24  # augmented hidden: 16 real units + 1 bias row + pad to multiple of 8


def mine_net_kernel(xy_ref, w12_ref, b12_ref, w3_ref, out_ref):
    """One batch tile, batch on the lane axis.

    xy_ref  : (8, TB)   -- rows 0..3 = x features, rows 4..7 = y features
    w12_ref : (HA, 8)   -- fused [w1 | w2] (rows 16.. are zero padding)
    b12_ref : (HA, 1)   -- b1 + b2 (row 16 = 1.0 -> constant unit for fc3 bias)
    w3_ref  : (HA, 1)   -- fc3 weights (row 16 = b3, rows 17.. = 0)
    out_ref : (1, TB)
    """
    # Layer 1+2 fused: (HA, 8) @ (8, TB) on the MXU, f32 accumulation.
    h = jnp.dot(w12_ref[...], xy_ref[...], preferred_element_type=jnp.float32)
    h = jnp.maximum(h + b12_ref[...], 0.0)              # (HA, TB) on the VPU
    # fc3: VPU multiply + sublane (XLU) reduction; b3 already folded in via
    # the augmented hidden row -> no N=1 MXU matmul, no scalar operand.
    out_ref[...] = jnp.sum(h * w3_ref[...], axis=0, keepdims=True)


def mine_net_forward(x, y, params, block_b=512):
    """x, y: (B, 4) float32 -> (B, 1) float32 == fc3(relu(fc1(x) + fc2(y)))."""
    w1, b1, w2, b2, w3, b3 = params
    B = x.shape[0]

    # Batch tile: multiple of 128 lanes, clamped so tiny batches pad minimally.
    tb = min(block_b, ((B + 127) // 128) * 128)
    num_blocks = pl.cdiv(B, tb)
    b_pad = num_blocks * tb

    # ---- host-side glue (layout plumbing, pure XLA) -------------------------
    # Fused first-layer weights: h = relu([w1|w2] @ [x;y]^T + (b1+b2)).
    w12 = jnp.zeros((HA, 8), jnp.float32).at[:16].set(
        jnp.concatenate([w1, w2], axis=1))               # (HA, 8)
    b12 = (jnp.zeros((HA, 1), jnp.float32)
           .at[:16, 0].set(b1 + b2)
           .at[16, 0].set(1.0))                           # bias row -> relu(1)=1
    w3a = (jnp.zeros((HA, 1), jnp.float32)
           .at[:16, 0].set(w3[0])
           .at[16, 0].set(b3[0]))                         # folds fc3 bias

    # Batch on lanes: (8, B), zero-padded up to b_pad lanes.
    xyT = jnp.concatenate([x.T, y.T], axis=0)             # (8, B)
    xyT = jnp.pad(xyT, ((0, 0), (0, b_pad - B)))          # (8, b_pad)
    # -------------------------------------------------------------------------

    out = pl.pallas_call(
        mine_net_kernel,
        out_shape=jax.ShapeDtypeStruct((1, b_pad), jnp.float32),
        grid=(num_blocks,),
        in_specs=[
            pl.BlockSpec((8, tb), lambda i: (0, i)),      # streamed input tile
            pl.BlockSpec((HA, 8), lambda i: (0, 0)),      # resident weights
            pl.BlockSpec((HA, 1), lambda i: (0, 0)),
            pl.BlockSpec((HA, 1), lambda i: (0, 0)),
        ],
        out_specs=pl.BlockSpec((1, tb), lambda i: (0, i)),  # lane-dense store
        compiler_params=pltpu.CompilerParams(
            dimension_semantics=("parallel",)),
    )(xyT, w12, b12, w3a)

    return out[0, :B].reshape(B, 1)


def init_params(key):
    """Deterministic synthetic init matching nn.Linear shapes:
       fc1: Linear(4, 16), fc2: Linear(4, 16), fc3: Linear(16, 1)."""
    k1, k2, k3, k4, k5, k6 = jax.random.split(key, 6)

    def uniform(k, shape, fan_in):
        bound = 1.0 / jnp.sqrt(fan_in)
        return jax.random.uniform(k, shape, jnp.float32, -bound, bound)

    w1 = uniform(k1, (16, 4), 4.0)
    b1 = uniform(k2, (16,), 4.0)
    w2 = uniform(k3, (16, 4), 4.0)
    b2 = uniform(k4, (16,), 4.0)
    w3 = uniform(k5, (1, 16), 16.0)
    b3 = uniform(k6, (1,), 16.0)
    return (w1, b1, w2, b2, w3, b3)


def reference_forward(x, y, params):
    """Pure-JAX reference for correctness check (matches the PyTorch module)."""
    w1, b1, w2, b2, w3, b3 = params
    h1 = jax.nn.relu(x @ w1.T + b1 + y @ w2.T + b2)
    return h1 @ w3.T + b3


if __name__ == "__main__":
    key = jax.random.PRNGKey(0)
    kp, kx, ky = jax.random.split(key, 3)

    params = init_params(kp)

    B = 8  # small, intentionally not a multiple of 128 -> exercises padding
    x = jax.random.normal(kx, (B, 4), jnp.float32)
    y = jax.random.normal(ky, (B, 4), jnp.float32)

    out = mine_net_forward(x, y, params)
    out = jax.block_until_ready(out)

    ref = reference_forward(x, y, params)
    assert out.shape == (B, 1)
    assert jnp.allclose(out, ref, atol=1e-5, rtol=1e-5)

    # TODO(synk): `mi()` (random permutation of y + logsumexp-style MINE
    # estimator) is host-side training glue, not part of the forward kernel.
    print("KERNEL_OK")
</pallas_src>

<mosaic_0001>
module attributes {stable_mosaic.version = 11 : i64} {
  func.func @mine_net_kernel(%arg0: i32, %arg1: memref<8x128xf32, #tpu.memory_space<vmem>>, %arg2: memref<24x8xf32, #tpu.memory_space<vmem>>, %arg3: memref<24x1xf32, #tpu.memory_space<vmem>>, %arg4: memref<24x1xf32, #tpu.memory_space<vmem>>, %arg5: memref<1x128xf32, #tpu.memory_space<vmem>>) attributes {dimension_semantics = [#tpu.dimension_semantics<parallel>], iteration_bounds = array<i64: 1>, scalar_prefetch = 0 : i64, scratch_operands = 0 : i64, tpu.core_type = #tpu.core_type<tc>, window_params = [{transform_indices = @transform_0, window_bounds = array<i64: 8, 128>}, {pipeline_mode = #tpu.pipeline_mode<synchronous>, transform_indices = @transform_1, window_bounds = array<i64: 24, 8>}, {pipeline_mode = #tpu.pipeline_mode<synchronous>, transform_indices = @transform_2, window_bounds = array<i64: 24, 1>}, {pipeline_mode = #tpu.pipeline_mode<synchronous>, transform_indices = @transform_3, window_bounds = array<i64: 24, 1>}, {transform_indices = @transform_4, window_bounds = array<i64: 1, 128>}]} {
    %c0 = arith.constant 0 : index
    %c0_0 = arith.constant 0 : index
    %0 = vector.load %arg2[%c0, %c0_0] : memref<24x8xf32, #tpu.memory_space<vmem>>, vector<24x8xf32>
    %c0_1 = arith.constant 0 : index
    %c0_2 = arith.constant 0 : index
    %1 = vector.load %arg1[%c0_1, %c0_2] : memref<8x128xf32, #tpu.memory_space<vmem>>, vector<8x128xf32>
    %cst = arith.constant dense<0.000000e+00> : vector<24x128xf32>
    %2 = tpu.matmul %0, %1, %cst {dimension_numbers = #tpu.dot_dimension_numbers<[1], [0], [0], [1], [0, 0, 1, 1], [], []>} : vector<24x8xf32>, vector<8x128xf32>, vector<24x128xf32> -> vector<24x128xf32>
    %c0_3 = arith.constant 0 : index
    %c0_4 = arith.constant 0 : index
    %3 = vector.load %arg3[%c0_3, %c0_4] : memref<24x1xf32, #tpu.memory_space<vmem>>, vector<24x1xf32>
    %4 = vector.broadcast %3 : vector<24x1xf32> to vector<24x128xf32>
    %5 = arith.addf %2, %4 : vector<24x128xf32>
    %cst_5 = arith.constant 0.000000e+00 : f32
    %6 = vector.broadcast %cst_5 : f32 to vector<24x128xf32>
    %7 = arith.maximumf %5, %6 : vector<24x128xf32>
    %c0_6 = arith.constant 0 : index
    %c0_7 = arith.constant 0 : index
    %8 = vector.load %arg4[%c0_6, %c0_7] : memref<24x1xf32, #tpu.memory_space<vmem>>, vector<24x1xf32>
    %9 = vector.broadcast %8 : vector<24x1xf32> to vector<24x128xf32>
    %10 = arith.mulf %7, %9 : vector<24x128xf32>
    %cst_8 = arith.constant dense<0.000000e+00> : vector<128xf32>
    %11 = vector.multi_reduction <add>, %10, %cst_8 [0] : vector<24x128xf32> to vector<128xf32>
    %12 = vector.shape_cast %11 : vector<128xf32> to vector<1x128xf32>
    %c0_9 = arith.constant 0 : index
    %c0_10 = arith.constant 0 : index
    %13 = vector.load %arg5[%c0_9, %c0_10] : memref<1x128xf32, #tpu.memory_space<vmem>>, vector<1x128xf32>
    tpu.vector_store %arg5[%c0_9, %c0_10], %12 {strides = array<i32>} : memref<1x128xf32, #tpu.memory_space<vmem>>, vector<1x128xf32>,
    return
  }
  func.func @transform_0(%arg0: i32) -> (i32, i32) {
    %c0_i32 = arith.constant 0 : i32
    %c0_i32_0 = arith.constant 0 : i32
    return %c0_i32, %arg0 : i32, i32
  }
  func.func @transform_1(%arg0: i32) -> (i32, i32) {
    %c0_i32 = arith.constant 0 : i32
    %c0_i32_0 = arith.constant 0 : i32
    %c0_i32_1 = arith.constant 0 : i32
    return %c0_i32, %c0_i32_0 : i32, i32
  }
  func.func @transform_2(%arg0: i32) -> (i32, i32) {
    %c0_i32 = arith.constant 0 : i32
    %c0_i32_0 = arith.constant 0 : i32
    %c0_i32_1 = arith.constant 0 : i32
    return %c0_i32, %c0_i32_0 : i32, i32
  }
  func.func @transform_3(%arg0: i32) -> (i32, i32) {
    %c0_i32 = arith.constant 0 : i32
    %c0_i32_0 = arith.constant 0 : i32
    %c0_i32_1 = arith.constant 0 : i32
    return %c0_i32, %c0_i32_0 : i32, i32
  }
  func.func @transform_4(%arg0: i32) -> (i32, i32) {
    %c0_i32 = arith.constant 0 : i32
    %c0_i32_0 = arith.constant 0 : i32
    return %c0_i32, %arg0 : i32, i32
  }
}

</mosaic_0001>

<bundles_post_ra>
// kernel: tpu_custom_call.1
= control target key start
LH: loop header
LB: loop body
LE: loop exit
PB: predicated region body
PF: predicated region fallthrough
CT: control target
= control target key end

     0   :  { %v227_v1 = vmov 0.0   ;;  %vm40_vm0 = vcmask 64512   ;;  %vm228_vm1 = vmmov 0   ;;  %s301_s0 = inlined_call_operand.vmem [shape: f32[8,128], index: 0, kind: input, shape index: {}]   ;;  %s302_s1 = inlined_call_operand.vmem [shape: f32[24,8], index: 1, kind: input, shape index: {}]   ;;  %s303_s2 = inlined_call_operand.vmem [shape: f32[24,1], index: 2, kind: input, shape index: {}]   ;;  %s304_s3 = inlined_call_operand.vmem [shape: f32[24,1], index: 3, kind: input, shape index: {}]   ;;  %s305_s4 = inlined_call_operand.hbm [shape: f32[1,128], index: 4, kind: output, shape index: {}]  }
   0x1   :  { %v21_v0 = vld [vmem:[%s301_s0] sm:$0xff]  ;;  %184 = vmatprep.subr.mxu0 %v227_v1  ;;  %195 = vmatprep.subr.mxu1 %v227_v1  ;;  %v19_v3 = vld [vmem:[%s302_s1 + $0x8] sm:$0xff] }
   0x2   :  { %v18_v2 = vld [vmem:[%s302_s1] sm:$0xff]  ;;  %185 = vmatpush3.msra.mxu0 %v21_v0  ;;  %196 = vmatpush3.msra.mxu1 %v21_v0 }
   0x3   :  { %186 = vmatprep.mubr.msk.f32.mxu0 %vm228_vm1, %v227_v1  ;;  %189 = vmatprep.mubr.msk.f32.mxu1 %vm228_vm1, %v227_v1  ;;  %v22_v4 = vld [vmem:[%s303_s2] sm:$0xff] }
   0x4   :  { %9 = vsyncpa [#allocation3], 0  ;;  %187 = vmatmul.mubr.msk.f32.vlgmr.msra.gmra.mrb[0].mxu0 %vm40_vm0, %v18_v2  ;;  %190 = vmatmul.mubr.msk.f32.vlgmr.msra.gmra.mrb[0].mxu1 %vm40_vm0, %v19_v3  ;;  %v24_v5 = vld [vmem:[%s303_s2 + $0x10] sm:$0xff]  ;;  %v229_v7 = vmov 0   ;;  %v23_v8 = vld [vmem:[%s303_s2 + $0x8] sm:$0xff]  ;;  %s230_s2 = smov [#allocation2]  }
   0x5   :  { %192 = vmatprep.mubr.msk.f32.mxu1 %vm228_vm1, %v227_v1  ;;  %v20_v6 = vld [vmem:[%s302_s1 + $0x10] sm:$0xff]  ;;  %201 = vset.pattern.permute.xlu0 %v229_v7  ;;  %v133_v9 = vld [vmem:[%s304_s3] sm:$0xff]  ;;  %v134_v10 = vld [vmem:[%s304_s3 + $0x8] sm:$0xff] }
   0x6   :  { %27 = vperm.xlu0 %201, %v22_v4   ;;  %202 = vset.pattern.permute.xlu1 %v229_v7  ;;  %v135_v11 = vld [vmem:[%s304_s3 + $0x10] sm:$0xff]  ;;  %s169_s3 = sshll.u32 %s230_s2, 4  ;;  %s170_s3 = int_to_ptr.vmem [resolvable:$true] %s169_s3 }
   0x7   :  { %37 = vperm.xlu1 %202, %v24_v5   ;;  %s203_s7 = scalar_lea.vmem %s170_s3, 16  ;;  %s207_s8 = scalar_lea.vmem %s170_s3, 32 }
   0x8   :  { %193 = vmatmul.mubr.msk.f32.gmra.mrb[2].mxu1 %vm40_vm0, %v20_v6  ;;  %p204_p0 = scmp.ne.s32.totalorder %s170_s3, %s203_s7  ;;  %p208_p1 = scmp.lt.s32.totalorder %s170_s3, %s170_s3 }
   0x9   :  { %p209_p2 = scmp.lt.s32.totalorder %s207_s8, %s203_s7 }
   0xa   :  { %32 = vperm.xlu0 %201, %v23_v8  }
   0xb   :  { %138 = vperm.xlu1 %202, %v133_v9   ;;  %p210_p3 = por %p209_p2, %p208_p1 }
   0xd   :  { %p211_p4 = pnand %p210_p3, %p204_p0 }
   0xe   :  { %143 = vperm.xlu0 %201, %v134_v10  }
   0xf   :  { %148 = vperm.xlu1 %202, %v135_v11  }
  0x85   :  { %v28_v12 = vpop.permute.xlu0 %27 }
  0x86   :  { %v38_v13 = vpop.permute.xlu1 %37 }
  0x89   :  { %v33_v14 = vpop.permute.xlu0 %32 }
  0x8a   :  { %v139_v21 = vpop.permute.xlu1 %138 }
  0x8d   :  { %v144_v24 = vpop.permute.xlu0 %143 }
  0x8e   :  { %v149_v32 = vpop.permute.xlu1 %148 }
  0xd7   :  { %v116_v15 = vpop.f32.mrb[0].mxu0  ;;  %v121_v16 = vpop.f32.mrb[0].mxu1 }
  0xd8   :  { %v117_v17 = vadd.f32 %v116_v15, %v28_v12  ;;  %v122_v18 = vadd.f32 %v121_v16, %v33_v14  ;;  %v191_v19 = vpop.f32.mrb[1].mxu1  ;;  %v188_v20 = vpop.f32.mrb[1].mxu0 }
  0xda   :  { %v130_v22 = vmax.f32 %v117_v17, 0.0  ;;  %v131_v23 = vmax.f32 %v122_v18, 0.0 }
  0xdb   :  { %v126_v25 = vpop.f32.mrb[2].mxu1 }
  0xdc   :  { %v151_v26 = vmul.f32 %v139_v21, %v130_v22  ;;  %v152_v27 = vmul.f32 %v144_v24, %v131_v23  ;;  %v127_v28 = vadd.f32 %v126_v25, %v38_v13  ;;  %v194_v29 = vpop.f32.mrb[3].mxu1 }
  0xde   :  { %v154_v30 = vadd.f32 %v152_v27, %v151_v26  ;;  %v132_v31 = vmax.f32 %v127_v28, 0.0 }
  0xe0   :  { %v153_v33 = vmul.f32 %v149_v32, %v132_v31 }
  0xe2   :  { %v155_v34 = vadd.f32 %v154_v30, %v153_v33 }
  0xe4   :  { %v156_v35 = vrot.slane %v155_v34, 4 }
  0xe6   :  { %v157_v36 = vadd.f32 %v156_v35, %v155_v34 }
  0xe8   :  { %v158_v37 = vrot.slane %v157_v36, 2 }
  0xea   :  { %v159_v38 = vadd.f32 %v158_v37, %v157_v36 }
  0xec   :  { %v160_v39 = vrot.slane %v159_v38, 1 }
  0xee   :  { %v161_v40 = vadd.f32 %v160_v39, %v159_v38 }
  0xf0   :  { %162 = vst [vmem:[#allocation2] sm:$0x1] %v161_v40 }
  0xf1   :  { %214 = shalt.err (!%p211_p4)
}
  0xf2   :  { %s215_s11 = scalar_lea.hbm %s305_s4, 16 }
  0xf3   :  { %p216_p5 = scmp.ne.s32.totalorder %s305_s4, %s215_s11  ;;  %p219_p6 = scmp.lt.u32.totalorder %s215_s11, %s305_s4 }
  0xf5   :  { %p221_p7 = pnand %p219_p6, %p216_p5 }
  0xf7   :  { %224 = shalt.err (!%p221_p7)
}
  0xf8   :  { %172 = dma.vmem_to_hbm [thread:$0]  %s170_s3, 16, %s305_s4, [#allocation3]  }
  0xf9   :  { %225 = dma.done.wait [#allocation3], 16  }
  0xfa   :  { %226 = vsyncadd [#allocation3], 4294967280 }
  0xfb   :  { %176 = vsyncpa [#allocation3], 1 }

</bundles_post_ra>
